<compile_context>
chip_gen: v7x
topology: tpu7x:2x2x1
jax: 0.10.0
libtpu: 0.0.40
codegen_flags: <defaults>
</compile_context>

<pallas_src>
import jax
import jax.numpy as jnp
from jax.experimental import pallas as pl
from jax.experimental.pallas import tpu as pltpu


def _round_up(x, m):
    return (x + m - 1) // m * m


def _focal_loss_kernel(gamma, inv_b):
    g_float = float(gamma)
    gamma_is_int = g_float.is_integer() and 0.0 <= g_float <= 16.0
    g_int = int(g_float) if gamma_is_int else None

    def kernel(alpha_ref, logits_ref, target_ref, out_ref, acc_ref):
        step = pl.program_id(0)

        @pl.when(step == 0)
        def _init():
            acc_ref[...] = jnp.zeros_like(acc_ref)

        logits = logits_ref[...].astype(jnp.float32)          # (C, TB)
        tgt = target_ref[...]                                 # (1, TB) int32
        C = logits.shape[0]

        # log-softmax over the class axis (sublanes; C is tiny).
        m = jnp.max(logits, axis=0, keepdims=True)            # (1, TB)
        shifted = logits - m                                  # (C, TB)
        exp_shifted = jnp.exp(shifted)                        # (C, TB)  (EUP)
        sumexp = jnp.sum(exp_shifted, axis=0, keepdims=True)  # (1, TB)

        # Gather at the target class via masked select (no float one-hot).
        row = jax.lax.broadcasted_iota(jnp.int32, logits.shape, 0)
        sel = row == tgt                                      # (C, TB) bool
        shifted_t = jnp.sum(jnp.where(sel, shifted, 0.0), axis=0, keepdims=True)
        exp_t = jnp.sum(jnp.where(sel, exp_shifted, 0.0), axis=0, keepdims=True)

        logpt = shifted_t - jnp.log(sumexp)                   # (1, TB)
        pt = exp_t / sumexp                                   # reuse exp(shifted)

        # at = alpha_vec[target] (binary: alpha_vec = [alpha, 1 - alpha]).
        a0 = alpha_ref[0]
        a1 = alpha_ref[1]
        at = jnp.where(tgt == 0, a0, a1)                      # (1, TB)

        one_minus_pt = jnp.maximum(1.0 - pt, 0.0)
        if gamma_is_int:
            if g_int == 0:
                focal_w = jnp.ones_like(one_minus_pt)
            else:
                focal_w = one_minus_pt
                for _ in range(g_int - 1):                    # gamma=2 -> 1 mul
                    focal_w = focal_w * one_minus_pt
        else:
            focal_w = one_minus_pt ** g_float                 # pow fallback

        loss = -focal_w * (at * logpt)                        # (1, TB)
        valid = (tgt >= 0).astype(jnp.float32)                # mask batch padding
        acc_ref[...] += loss * valid

        @pl.when(step == pl.num_programs(0) - 1)
        def _finalize():
            out_ref[...] = (jnp.sum(acc_ref[...]) * inv_b).reshape(1, 1)

    return kernel


def focal_loss(logits, target, gamma=2.0, alpha=0.25, block_b=2048):
    """logits: (B, C) float, target: (B,) int. Returns scalar f32 loss."""
    B, C = logits.shape

    # Lane-dense layout: batch on the 128-lane axis (wrapper-side plumbing).
    logits_t = jnp.transpose(logits)                          # (C, B)
    tgt = target.reshape(1, B).astype(jnp.int32)              # (1, B)

    # Batch tile: multiple of 128 lanes, capped so one logits buffer stays
    # small (~<=4 MiB) -> safe with double buffering on v7x's 64 MiB VMEM.
    max_tile_bytes = 4 * 1024 * 1024
    tb_cap = max(128, (max_tile_bytes // (max(C, 1) * 4)) // 128 * 128)
    tb = min(block_b, tb_cap, _round_up(B, 128))
    bp = _round_up(B, tb)
    if bp != B:
        logits_t = jnp.pad(logits_t, ((0, 0), (0, bp - B)))
        tgt = jnp.pad(tgt, ((0, 0), (0, bp - B)), constant_values=-1)

    alpha_vec = jnp.array([alpha, 1.0 - alpha], dtype=jnp.float32)  # (2,) -> SMEM

    grid = (bp // tb,)
    cost = pl.CostEstimate(
        flops=int(12 * bp * C),
        transcendentals=int(bp * (C + 1)),
        bytes_accessed=int(logits_t.size * logits_t.dtype.itemsize
                           + tgt.size * 4 + 8 + 4),
    )

    # TODO(synk): on v7x the batch axis could instead emit per-tile partial
    # sums with "parallel" semantics to use both TensorCores; kept as a single
    # "arbitrary" accumulation axis here for simplicity.
    out = pl.pallas_call(
        _focal_loss_kernel(gamma, 1.0 / B),
        out_shape=jax.ShapeDtypeStruct((1, 1), jnp.float32),
        grid=grid,
        in_specs=[
            pl.BlockSpec(memory_space=pltpu.MemorySpace.SMEM),   # alpha_vec (2,)
            pl.BlockSpec((C, tb), lambda i: (0, i)),             # logits (C, Bp)
            pl.BlockSpec((1, tb), lambda i: (0, i)),             # target (1, Bp)
        ],
        out_specs=pl.BlockSpec((1, 1), lambda i: (0, 0)),
        scratch_shapes=[pltpu.VMEM((1, tb), jnp.float32)],       # lane-dense acc
        compiler_params=pltpu.CompilerParams(
            dimension_semantics=("arbitrary",)),
        cost_estimate=cost,
    )(alpha_vec, logits_t, tgt)
    return out[0, 0]


def _focal_loss_ref(logits, target, gamma=2.0, alpha=0.25):
    """Pure-JAX reference matching the PyTorch module."""
    alpha_vec = jnp.array([alpha, 1.0 - alpha], dtype=jnp.float32)
    logsm = jax.nn.log_softmax(logits.astype(jnp.float32), axis=-1)
    logpt = jnp.take_along_axis(logsm, target.reshape(-1, 1), axis=-1).reshape(-1)
    pt = jnp.exp(logpt)
    at = alpha_vec[target]
    loss = -1.0 * (1.0 - pt) ** gamma * (logpt * at)
    return jnp.mean(loss)


if __name__ == "__main__":
    key = jax.random.PRNGKey(0)
    k1, k2, k3, k4 = jax.random.split(key, 4)

    # Small shape matching the module (binary classification).
    batch, n_classes = 8, 2
    logits = jax.random.normal(k1, (batch, n_classes), dtype=jnp.float32)
    target = jax.random.randint(k2, (batch,), 0, n_classes, dtype=jnp.int32)

    out = focal_loss(logits, target, gamma=2.0, alpha=0.25)
    jax.block_until_ready(out)
    ref = _focal_loss_ref(logits, target, gamma=2.0, alpha=0.25)
    assert jnp.allclose(out, ref, atol=1e-5, rtol=1e-5), (out, ref)

    # Multi-tile path: exercises the batch grid, accumulation and pad masking.
    batch2 = 300
    logits2 = jax.random.normal(k3, (batch2, n_classes), dtype=jnp.float32)
    target2 = jax.random.randint(k4, (batch2,), 0, n_classes, dtype=jnp.int32)
    out2 = focal_loss(logits2, target2, gamma=2.0, alpha=0.25, block_b=128)
    jax.block_until_ready(out2)
    ref2 = _focal_loss_ref(logits2, target2, gamma=2.0, alpha=0.25)
    assert jnp.allclose(out2, ref2, atol=1e-5, rtol=1e-5), (out2, ref2)

    print("KERNEL_OK")
</pallas_src>

<mosaic_0001>
module attributes {stable_mosaic.version = 11 : i64} {
  func.func @kernel(%arg0: i32, %arg1: memref<2xf32, #tpu.memory_space<smem>>, %arg2: memref<2x128xf32, #tpu.memory_space<vmem>>, %arg3: memref<1x128xi32, #tpu.memory_space<vmem>>, %arg4: memref<1x1xf32, #tpu.memory_space<vmem>>, %arg5: memref<1x128xf32, #tpu.memory_space<vmem>>) attributes {dimension_semantics = [#tpu.dimension_semantics<arbitrary>], iteration_bounds = array<i64: 1>, scalar_prefetch = 0 : i64, scratch_operands = 1 : i64, tpu.core_type = #tpu.core_type<tc>, window_params = [{transform_indices = @transform_0, window_bounds = array<i64: 2>}, {transform_indices = @transform_1, window_bounds = array<i64: 2, 128>}, {transform_indices = @transform_2, window_bounds = array<i64: 1, 128>}, {pipeline_mode = #tpu.pipeline_mode<synchronous>, transform_indices = @transform_3, window_bounds = array<i64: 1, 1>}]} {
    %c0_i32 = arith.constant 0 : i32
    %0 = arith.cmpi eq, %arg0, %c0_i32 : i32
    %1 = arith.extui %0 : i1 to i32
    %c0_i32_0 = arith.constant 0 : i32
    %2 = arith.cmpi ne, %1, %c0_i32_0 : i32
    scf.if %2 {
      %cst_21 = arith.constant 0.000000e+00 : f32
      %53 = vector.broadcast %cst_21 : f32 to vector<1x128xf32>
      %c0_22 = arith.constant 0 : index
      %c0_23 = arith.constant 0 : index
      %54 = vector.load %arg5[%c0_22, %c0_23] : memref<1x128xf32, #tpu.memory_space<vmem>>, vector<1x128xf32>
      tpu.vector_store %arg5[%c0_22, %c0_23], %53 {strides = array<i32>} : memref<1x128xf32, #tpu.memory_space<vmem>>, vector<1x128xf32>,
    } else {
    }
    %c0 = arith.constant 0 : index
    %c0_1 = arith.constant 0 : index
    %3 = vector.load %arg2[%c0, %c0_1] : memref<2x128xf32, #tpu.memory_space<vmem>>, vector<2x128xf32>
    %c0_2 = arith.constant 0 : index
    %c0_3 = arith.constant 0 : index
    %4 = vector.load %arg3[%c0_2, %c0_3] : memref<1x128xi32, #tpu.memory_space<vmem>>, vector<1x128xi32>
    %cst = arith.constant dense<0xFF800000> : vector<128xf32>
    %5 = vector.multi_reduction <maximumf>, %3, %cst [0] : vector<2x128xf32> to vector<128xf32>
    %6 = vector.shape_cast %5 : vector<128xf32> to vector<1x128xf32>
    %7 = vector.broadcast %6 : vector<1x128xf32> to vector<2x128xf32>
    %8 = arith.subf %3, %7 : vector<2x128xf32>
    %9 = math.exp %8 : vector<2x128xf32>
    %cst_4 = arith.constant dense<0.000000e+00> : vector<128xf32>
    %10 = vector.multi_reduction <add>, %9, %cst_4 [0] : vector<2x128xf32> to vector<128xf32>
    %11 = vector.shape_cast %10 : vector<128xf32> to vector<1x128xf32>
    %12 = tpu.iota {dimensions = array<i32: 0>} : vector<2x128xi32>
    %13 = vector.broadcast %4 : vector<1x128xi32> to vector<2x128xi32>
    %14 = arith.cmpi eq, %12, %13 : vector<2x128xi32>
    %cst_5 = arith.constant 0.000000e+00 : f32
    %15 = vector.broadcast %cst_5 : f32 to vector<2x128xf32>
    %16 = arith.select %14, %8, %15 : vector<2x128xi1>, vector<2x128xf32>
    %cst_6 = arith.constant dense<0.000000e+00> : vector<128xf32>
    %17 = vector.multi_reduction <add>, %16, %cst_6 [0] : vector<2x128xf32> to vector<128xf32>
    %18 = vector.shape_cast %17 : vector<128xf32> to vector<1x128xf32>
    %cst_7 = arith.constant 0.000000e+00 : f32
    %19 = vector.broadcast %cst_7 : f32 to vector<2x128xf32>
    %20 = arith.select %14, %9, %19 : vector<2x128xi1>, vector<2x128xf32>
    %cst_8 = arith.constant dense<0.000000e+00> : vector<128xf32>
    %21 = vector.multi_reduction <add>, %20, %cst_8 [0] : vector<2x128xf32> to vector<128xf32>
    %22 = vector.shape_cast %21 : vector<128xf32> to vector<1x128xf32>
    %23 = math.log %11 : vector<1x128xf32>
    %24 = arith.subf %18, %23 : vector<1x128xf32>
    %25 = arith.divf %22, %11 : vector<1x128xf32>
    %c0_9 = arith.constant 0 : index
    %26 = memref.load %arg1[%c0_9] : memref<2xf32, #tpu.memory_space<smem>>
    %c1 = arith.constant 1 : index
    %27 = memref.load %arg1[%c1] : memref<2xf32, #tpu.memory_space<smem>>
    %c0_i32_10 = arith.constant 0 : i32
    %28 = vector.broadcast %c0_i32_10 : i32 to vector<1x128xi32>
    %29 = arith.cmpi eq, %4, %28 : vector<1x128xi32>
    %30 = vector.broadcast %26 : f32 to vector<1x128xf32>
    %31 = vector.broadcast %27 : f32 to vector<1x128xf32>
    %32 = arith.select %29, %30, %31 : vector<1x128xi1>, vector<1x128xf32>
    %cst_11 = arith.constant 1.000000e+00 : f32
    %33 = vector.broadcast %cst_11 : f32 to vector<1x128xf32>
    %34 = arith.subf %33, %25 : vector<1x128xf32>
    %cst_12 = arith.constant 0.000000e+00 : f32
    %35 = vector.broadcast %cst_12 : f32 to vector<1x128xf32>
    %36 = arith.maximumf %34, %35 : vector<1x128xf32>
    %37 = arith.mulf %36, %36 : vector<1x128xf32>
    %cst_13 = arith.constant 0.000000e+00 : f32
    %38 = vector.broadcast %cst_13 : f32 to vector<1x128xf32>
    %39 = arith.subf %38, %37 : vector<1x128xf32>
    %40 = arith.mulf %32, %24 : vector<1x128xf32>
    %41 = arith.mulf %39, %40 : vector<1x128xf32>
    %c0_i32_14 = arith.constant 0 : i32
    %42 = vector.broadcast %c0_i32_14 : i32 to vector<1x128xi32>
    %43 = arith.cmpi sge, %4, %42 : vector<1x128xi32>
    %44 = arith.extui %43 : vector<1x128xi1> to vector<1x128xi32>
    %45 = arith.sitofp %44 : vector<1x128xi32> to vector<1x128xf32>
    %c0_15 = arith.constant 0 : index
    %c0_16 = arith.constant 0 : index
    %46 = vector.load %arg5[%c0_15, %c0_16] : memref<1x128xf32, #tpu.memory_space<vmem>>, vector<1x128xf32>
    %47 = arith.mulf %41, %45 : vector<1x128xf32>
    %48 = arith.addf %46, %47 : vector<1x128xf32>
    %c0_17 = arith.constant 0 : index
    %c0_18 = arith.constant 0 : index
    %49 = vector.load %arg5[%c0_17, %c0_18] : memref<1x128xf32, #tpu.memory_space<vmem>>, vector<1x128xf32>
    tpu.vector_store %arg5[%c0_17, %c0_18], %48 {strides = array<i32>} : memref<1x128xf32, #tpu.memory_space<vmem>>, vector<1x128xf32>,
    %c0_i32_19 = arith.constant 0 : i32
    %50 = arith.cmpi eq, %arg0, %c0_i32_19 : i32
    %51 = arith.extui %50 : i1 to i32
    %c0_i32_20 = arith.constant 0 : i32
    %52 = arith.cmpi ne, %51, %c0_i32_20 : i32
    scf.if %52 {
      %c0_21 = arith.constant 0 : index
      %c0_22 = arith.constant 0 : index
      %53 = vector.load %arg5[%c0_21, %c0_22] : memref<1x128xf32, #tpu.memory_space<vmem>>, vector<1x128xf32>
      %54 = vector.shape_cast %53 : vector<1x128xf32> to vector<1x1x128xf32>
      %cst_23 = arith.constant dense<0.000000e+00> : vector<1xf32>
      %55 = vector.multi_reduction <add>, %54, %cst_23 [1, 2] : vector<1x1x128xf32> to vector<1xf32>
      %56 = vector.shape_cast %55 : vector<1xf32> to vector<1x1x1xf32>
      %57 = vector.extract %56[0, 0, 0] : f32 from vector<1x1x1xf32>
      %cst_24 = arith.constant 1.250000e-01 : f32
      %58 = arith.mulf %57, %cst_24 : f32
      %59 = vector.broadcast %58 : f32 to vector<1x1xf32>
      %c0_25 = arith.constant 0 : index
      %c0_26 = arith.constant 0 : index
      %60 = vector.load %arg4[%c0_25, %c0_26] : memref<1x1xf32, #tpu.memory_space<vmem>>, vector<1x1xf32>
      tpu.vector_store %arg4[%c0_25, %c0_26], %59 {strides = array<i32>} : memref<1x1xf32, #tpu.memory_space<vmem>>, vector<1x1xf32>,
    } else {
    }
    return
  }
  func.func @transform_0(%arg0: i32) -> i32 {
    %c0_i32 = arith.constant 0 : i32
    %c0_i32_0 = arith.constant 0 : i32
    return %c0_i32 : i32
  }
  func.func @transform_1(%arg0: i32) -> (i32, i32) {
    %c0_i32 = arith.constant 0 : i32
    %c0_i32_0 = arith.constant 0 : i32
    return %c0_i32, %arg0 : i32, i32
  }
  func.func @transform_2(%arg0: i32) -> (i32, i32) {
    %c0_i32 = arith.constant 0 : i32
    %c0_i32_0 = arith.constant 0 : i32
    return %c0_i32, %arg0 : i32, i32
  }
  func.func @transform_3(%arg0: i32) -> (i32, i32) {
    %c0_i32 = arith.constant 0 : i32
    %c0_i32_0 = arith.constant 0 : i32
    %c0_i32_1 = arith.constant 0 : i32
    return %c0_i32, %c0_i32_0 : i32, i32
  }
}

</mosaic_0001>

<bundles_post_ra>
// kernel: tpu_custom_call.1
= control target key start
LH: loop header
LB: loop body
LE: loop exit
PB: predicated region body
PF: predicated region fallthrough
CT: control target
= control target key end

     0   :  { %8 = vsyncpa [#allocation5], 0  ;;  %s238_s0 = inlined_call_operand.hbm [shape: f32[2], index: 0, kind: input, shape index: {}]   ;;  %s239_s1 = inlined_call_operand.vmem [shape: f32[2,128], index: 1, kind: input, shape index: {}]   ;;  %s240_s2 = inlined_call_operand.vmem [shape: s32[1,128], index: 2, kind: input, shape index: {}]   ;;  %s241_s3 = inlined_call_operand.hbm [shape: f32[1,1], index: 3, kind: output, shape index: {}]  }
   0x1   :  { %9 = vsyncpa [#allocation4], 0  ;;  %s145_s14 = scalar_lea.hbm %s238_s0, 16 }
   0x2   :  { %p146_p0 = scmp.ne.s32.totalorder %s238_s0, %s145_s14  ;;  %p149_p1 = scmp.lt.u32.totalorder %s145_s14, %s238_s0 }
   0x4   :  { %p151_p2 = pnand %p149_p1, %p146_p0 }
   0x6   :  { %154 = shalt.err (!%p151_p2)
}
   0x7   :  { %s181_s19 = smov [#allocation3]  }
   0x8   :  { %17 = dma.hbm_to_smem %s238_s0, 16, %s181_s19, [#allocation5]  }
   0x9   :  { %177 = dma.done.wait [#allocation5], 16  }
   0xa   :  { %178 = vsyncadd [#allocation5], 4294967280 }
   0xb   :  { %25 = sfence }
   0xc   :  { %v31_v0 = vld [vmem:[%s239_s1] sm:$0x3]  ;;  %vm33_vm0 = vcmask 1041408   ;;  %v182_v1 = vmov 0.0   ;;  %v51_v7 = vlaneseq  ;;  %s79_s1 = sld [smem:[#allocation3]]  ;;  %vm102_vm4 = vcmask 1040384  }
   0xd   :  { %30 = vst [vmem:[#allocation2] sm:$0x1] %v182_v1  ;;  %v34_v2 = vsel %vm33_vm0, %v31_v0, -inf  ;;  %v32_v14 = vld [vmem:[%s240_s2] sm:$0x1]  ;;  %s132_s2 = sld [smem:[#allocation3 + $0x1]] }
   0xe   :  { %v35_v3 = vrot.slane %v34_v2, 4  ;;  %v52_v10 = vshrl.u32 %v51_v7, 7  ;;  %vm81_vm2 = vcmp.eq.s32.totalorder %v32_v14, 0  ;;  %vm91_vm3 = vcmp.ge.s32.totalorder %v32_v14, 0  ;;  %s183_s25 = smov [#allocation6]  }
   0xf   :  { %v133_v53 = vsel %vm91_vm3, 1.0, %v182_v1  ;;  %s123_s26 = sshll.u32 %s183_s25, 4  ;;  %vm115_vm5 = vcmask 0   ;;  %s124_s26 = int_to_ptr.vmem [resolvable:$true] %s123_s26 }
  0x10   :  { %v36_v4 = vmax.f32 %v34_v2, %v35_v3  ;;  %v55_v13 = vsub.s32 0, %v52_v10  ;;  %s155_s29 = scalar_lea.vmem %s124_s26, 16  ;;  %s159_s30 = scalar_lea.vmem %s124_s26, 32 }
  0x11   :  { %p156_p3 = scmp.ne.s32.totalorder %s124_s26, %s155_s29  ;;  %p160_p4 = scmp.lt.s32.totalorder %s124_s26, %s124_s26 }
  0x12   :  { %v37_v5 = vrot.slane %v36_v4, 2  ;;  %v56_v15 = vrot.slane %v32_v14, %v55_v13  ;;  %v82_v44 = vstv %s79_s1  ;;  %p161_p5 = scmp.lt.s32.totalorder %s159_s30, %s155_s29 }
  0x13   :  { %v83_v45 = vstv %s132_s2 }
  0x14   :  { %v38_v6 = vmax.f32 %v36_v4, %v37_v5  ;;  %vm57_vm1 = vcmp.eq.s32.totalorder %v52_v10, %v56_v15  ;;  %v84_v48 = vsel %vm81_vm2, %v82_v44, %v83_v45  ;;  %v94_v55 = vld [vmem:[#allocation2] sm:$0x1]  ;;  %p162_p6 = por %p161_p5, %p160_p4 }
  0x16   :  { %v39_v8 = vrot.slane %v38_v6, 1  ;;  %p163_p7 = pnand %p162_p6, %p156_p3 }
  0x18   :  { %v40_v9 = vmax.f32 %v38_v6, %v39_v8 }
  0x1a   :  { %v41_v11 = vsub.f32 %v31_v0, %v40_v9 }
  0x1c   :  { %v42_v12 = vmul.f32 1.442695, %v41_v11  ;;  %v58_v16 = vsel %vm57_vm1, %v41_v11, 0.0 }
  0x1d   :  { %v59_v19 = vsel %vm33_vm0, %v58_v16, 0.0 }
  0x1e   :  { %139 = vpow2.f32 %v42_v12  ;;  %v60_v25 = vrot.slane %v59_v19, 4 }
  0x20   :  { %v61_v29 = vadd.f32 %v60_v25, %v59_v19 }
  0x22   :  { %v62_v33 = vrot.slane %v61_v29, 2 }
  0x24   :  { %v63_v35 = vadd.f32 %v62_v33, %v61_v29 }
  0x26   :  { %v64_v37 = vrot.slane %v63_v35, 1 }
  0x28   :  { %v140_v17 = vpop.eup %139  ;;  %v65_v40 = vadd.f32 %v64_v37, %v63_v35 }
  0x29   :  { %v44_v18 = vsel %vm33_vm0, %v140_v17, 0.0  ;;  %v66_v20 = vsel %vm57_vm1, %v140_v17, 0.0 }
  0x2a   :  { %v45_v21 = vrot.slane %v44_v18, 4  ;;  %v67_v22 = vsel %vm33_vm0, %v66_v20, 0.0 }
  0x2b   :  { %v68_v23 = vrot.slane %v67_v22, 4 }
  0x2c   :  { %v46_v24 = vadd.f32 %v45_v21, %v44_v18 }
  0x2d   :  { %v69_v27 = vadd.f32 %v68_v23, %v67_v22 }
  0x2e   :  { %v47_v26 = vrot.slane %v46_v24, 2 }
  0x2f   :  { %v70_v31 = vrot.slane %v69_v27, 2 }
  0x30   :  { %v48_v28 = vadd.f32 %v47_v26, %v46_v24 }
  0x31   :  { %v71_v34 = vadd.f32 %v70_v31, %v69_v27 }
  0x32   :  { %v49_v30 = vrot.slane %v48_v28, 1 }
  0x33   :  { %v72_v36 = vrot.slane %v71_v34, 1 }
  0x34   :  { %v50_v32 = vadd.f32 %v49_v30, %v48_v28 }
  0x35   :  { %v73_v38 = vadd.f32 %v72_v36, %v71_v34 }
  0x36   :  { %141 = vlog2.f32 %v50_v32 }
  0x37   :  { %143 = vrcp.f32 %v50_v32 }
  0x40   :  { %v142_v39 = vpop.eup %141 }
  0x41   :  { %v144_v41 = vpop.eup %143  ;;  %v75_v42 = vmul.f32 0.6931472, %v142_v39 }
  0x42   :  { %v78_v43 = vmul.f32 %v144_v41, %v73_v38 }
  0x43   :  { %v76_v46 = vsub.f32 %v65_v40, %v75_v42 }
  0x44   :  { %v85_v47 = vsub.f32 1.0, %v78_v43 }
  0x45   :  { %v89_v51 = vmul.f32 %v84_v48, %v76_v46 }
  0x46   :  { %v86_v49 = vmax.f32 %v85_v47, 0.0 }
  0x48   :  { %v87_v50 = vmul.f32 %v86_v49, %v86_v49 }
  0x4a   :  { %v88_v52 = vsub.f32 0.0, %v87_v50 }
  0x4c   :  { %v90_v54 = vmul.f32 %v89_v51, %v88_v52 }
  0x4e   :  { %v95_v56 = vmul.f32 %v133_v53, %v90_v54 }
  0x50   :  { %v96_v57 = vadd.f32 %v95_v56, %v94_v55 }
  0x52   :  { %97 = vst [vmem:[#allocation2] sm:$0x1] %v96_v57 }
  0x59   :  { %v101_v58 = vld [vmem:[#allocation2] sm:$0x1] }
  0x5a   :  { %v103_v59 = vsel %vm102_vm4, %v101_v58, 0.0 }
  0x5b   :  { %104 = vadd.xlane.f32.xlu0 %v103_v59 }
  0xe8   :  { %v105_v60 = vpop.xlane.xlu0 %104 }
  0xe9   :  { %v106_v61 = vrot.slane %v105_v60, 4 }
  0xeb   :  { %v107_v62 = vadd.f32 %v106_v61, %v105_v60 }
  0xed   :  { %v108_v63 = vrot.slane %v107_v62, 2 }
  0xef   :  { %v109_v0 = vadd.f32 %v108_v63, %v107_v62 }
  0xf1   :  { %v110_v2 = vrot.slane %v109_v0, 1 }
  0xf3   :  { %v111_v3 = vadd.f32 %v110_v2, %v109_v0 }
  0xf5   :  { %134 = vpush %v111_v3 }
 0x126   :  { %s135_s27 = spop %134 }
 0x127   :  { %s113_s28 = smul.f32 0.125, %s135_s27 }
 0x129   :  { %v114_v1 = vstv %s113_s28 }
 0x12a   :  { %116 = vst.msk [vmem:[#allocation6] sm:$0x1] %vm115_vm5, %v114_v1 }
 0x12b   :  { %166 = shalt.err (!%p163_p7)
}
 0x12c   :  { %s167_s6 = scalar_lea.hbm %s241_s3, 16 }
 0x12d   :  { %p168_p8 = scmp.ne.s32.totalorder %s241_s3, %s167_s6  ;;  %p171_p9 = scmp.lt.u32.totalorder %s167_s6, %s241_s3 }
 0x12f   :  { %p173_p10 = pnand %p171_p9, %p168_p8 }
 0x131   :  { %176 = shalt.err (!%p173_p10)
}
 0x132   :  { %126 = dma.vmem_to_hbm [thread:$0]  %s124_s26, 16, %s241_s3, [#allocation4]  }
 0x133   :  { %179 = dma.done.wait [#allocation4], 16  }
 0x134   :  { %180 = vsyncadd [#allocation4], 4294967280 }
 0x135   :  { %130 = vsyncpa [#allocation4], 1 }
 0x136   :  { %131 = vsyncpa [#allocation5], 1 }

</bundles_post_ra>
